<compile_context>
chip_gen: v5e
topology: v5e:2x2
jax: 0.10.0
libtpu: 0.0.40
codegen_flags: <defaults>
</compile_context>

<pallas_src>
import jax
import jax.numpy as jnp
from jax.experimental import pallas as pl
from jax.experimental.pallas import tpu as pltpu


# ----------------------------- Pallas kernel -------------------------------

def rnn_wavefront_kernel(xpad_ref,            # (T, B, 3H) f32: x@Wih0^T+b0 in lanes [0,H), zeros elsewhere
                         wblk_ref,            # (3H, 3H) bf16 block recurrent weight (see pack_params)
                         bmid_ref,            # (1, 3H) f32: [0, b1, 0]     (superstep 1)
                         bfull_ref,           # (1, 3H) f32: [0, b1, b2]    (supersteps >= 2)
                         wfc_ref,             # (1, 3H) f32: fc weight in lanes [2H,3H), zeros elsewhere
                         bfc_ref,             # (1, 1)  f32
                         y_ref):              # (B, 1)  f32
    """3-layer ReLU RNN as a wavefront: one block GEMM per superstep.

    At superstep s the slab lanes hold [h0[s], h1[s-1], h2[s-2]]; every layer's
    inputs come from the previous superstep's slab, so the whole update is a
    single (B,3H)@(3H,3H) matmul + bias + ReLU.  Initial-state correctness at
    the wavefront head is handled purely by masking the bias (bmid/bfull);
    the tail garbage in the h0/h1 lanes during the 2-step drain is never read
    (the fc weight is zero outside the h2 lanes).
    """
    T, B, H3 = xpad_ref.shape

    # Weights resident for the whole unrolled loop; bias broadcasts hoisted
    # (JAX does not CSE broadcast_in_dim).
    wblk = wblk_ref[...]                                        # (3H, 3H) bf16
    bias_mid = jnp.broadcast_to(bmid_ref[...], (B, H3))         # (B, 3H)
    bias_full = jnp.broadcast_to(bfull_ref[...], (B, H3))       # (B, 3H)

    # Superstep 0: all states are zero, so the recurrent matmul contributes
    # nothing -> skip it.  Lanes [H,3H) of xpad are zero, so h1/h2 stay 0.
    slab = jnp.maximum(xpad_ref[0], 0.0)                        # (B, 3H) f32

    # Supersteps 1 .. T+1: T-1 steady steps + 2-step pipeline drain.
    # Fully unrolled (T static & small) for full cross-step scheduler view.
    for s in range(1, T + 2):
        acc = jnp.dot(slab.astype(jnp.bfloat16), wblk,
                      preferred_element_type=jnp.float32)       # (B, 3H) f32
        pre = acc + (bias_mid if s == 1 else bias_full)
        if s < T:                                               # static guard
            pre = pre + xpad_ref[s]
        slab = jnp.maximum(pre, 0.0)

    # Final Linear(H, 1): h2[T-1] sits in lanes [2H, 3H); wfc is zero outside
    # those lanes, so a plain lane reduction over the whole slab is exact.
    y_ref[...] = (jnp.sum(slab * wfc_ref[...], axis=-1, keepdims=True)
                  + bfc_ref[...])


# --------------------- one-time parameter packing ---------------------------

def pack_params(params):
    """Build all kernel-side constants once (NOT per forward call)."""
    f32 = jnp.float32
    H = params["whh0"].shape[0]
    F = params["wih0"].shape[1]
    H3 = 3 * H

    # Layer-0 input projection weight/bias, padded to 3H output lanes so the
    # wrapper einsum directly produces the lane-padded xproj slab.
    wih0_pad = jnp.zeros((F, H3), f32).at[:, :H].set(params["wih0"].T)
    b0_pad = jnp.zeros((H3,), f32).at[:H].set(params["bih0"] + params["bhh0"])

    # Block recurrent weight for the wavefront GEMM:
    #   [h0_prev | h1_prev | h2_prev] @ W  ->  [pre_h0 | pre_h1 | pre_h2]
    w = jnp.zeros((H3, H3), f32)
    w = w.at[0:H,       0:H      ].set(params["whh0"].T)
    w = w.at[0:H,       H:2 * H  ].set(params["wih1"].T)
    w = w.at[H:2 * H,   H:2 * H  ].set(params["whh1"].T)
    w = w.at[H:2 * H,   2 * H:H3 ].set(params["wih2"].T)
    w = w.at[2 * H:H3,  2 * H:H3 ].set(params["whh2"].T)
    w_block = w.astype(jnp.bfloat16)          # single-pass MXU operand

    # Folded per-step biases (PyTorch adds b_ih + b_hh every step), masked per
    # wavefront phase: superstep 1 must not yet apply b2 (keeps h2's initial
    # state exactly zero); superstep 0 applies neither (handled in-kernel by
    # skipping the bias entirely).
    b1 = params["bih1"] + params["bhh1"]
    b2 = params["bih2"] + params["bhh2"]
    bias_mid = jnp.zeros((1, H3), f32).at[0, H:2 * H].set(b1)
    bias_full = bias_mid.at[0, 2 * H:H3].set(b2)

    # fc weight padded to 3H lanes (zeros outside the h2 block) + bias.
    wfc_pad = jnp.zeros((1, H3), f32).at[0, 2 * H:H3].set(params["wfc"][0])
    bfc = params["bfc"].reshape(1, 1).astype(f32)

    return {"wih0_pad": wih0_pad, "b0_pad": b0_pad, "w_block": w_block,
            "bias_mid": bias_mid, "bias_full": bias_full,
            "wfc_pad": wfc_pad, "bfc": bfc}


# ------------------------------- wrapper ------------------------------------

@jax.jit
def rnn_model_forward(x, packed):
    """x: (B, T, 3) float32 -> y: (B, 1) float32 (matches PyTorch RNN_Model)."""
    B, T, _ = x.shape

    # The only per-call pre-kernel op: layer-0 input projection for ALL
    # timesteps, time-major, already lane-padded to 3H (lanes [H,3H) are zero
    # because wih0_pad/b0_pad are zero there).  Off the recurrence chain.
    xpad = jnp.einsum("btf,fh->tbh", x.astype(jnp.float32), packed["wih0_pad"],
                      precision=jax.lax.Precision.HIGHEST) + packed["b0_pad"]

    inputs = (xpad, packed["w_block"], packed["bias_mid"], packed["bias_full"],
              packed["wfc_pad"], packed["bfc"])

    return pl.pallas_call(
        rnn_wavefront_kernel,
        out_shape=jax.ShapeDtypeStruct((B, 1), jnp.float32),
        in_specs=[pl.BlockSpec(memory_space=pltpu.MemorySpace.VMEM)
                  for _ in inputs],
        out_specs=pl.BlockSpec(memory_space=pltpu.MemorySpace.VMEM),
    )(*inputs)


# --------------------------- parameter init ----------------------------------

def init_params(key, hidden_size, input_size=3):
    """Deterministic init mirroring PyTorch's U(-1/sqrt(H), 1/sqrt(H))."""
    k = 1.0 / jnp.sqrt(jnp.float32(hidden_size))
    names_shapes = [
        ("wih0", (hidden_size, input_size)),
        ("whh0", (hidden_size, hidden_size)),
        ("bih0", (hidden_size,)),
        ("bhh0", (hidden_size,)),
        ("wih1", (hidden_size, hidden_size)),
        ("whh1", (hidden_size, hidden_size)),
        ("bih1", (hidden_size,)),
        ("bhh1", (hidden_size,)),
        ("wih2", (hidden_size, hidden_size)),
        ("whh2", (hidden_size, hidden_size)),
        ("bih2", (hidden_size,)),
        ("bhh2", (hidden_size,)),
        ("wfc", (1, hidden_size)),
        ("bfc", (1,)),
    ]
    params = {}
    keys = jax.random.split(key, len(names_shapes))
    for (name, shape), kk in zip(names_shapes, keys):
        params[name] = jax.random.uniform(kk, shape, jnp.float32,
                                          minval=-k, maxval=k)
    return params


# ------------------------- pure-JAX references --------------------------------

def reference_forward(x, params):
    """Full-f32 reference mirroring PyTorch semantics (precision pinned)."""
    B, T, _ = x.shape
    H = params["whh0"].shape[0]
    hp = jax.lax.Precision.HIGHEST
    h0 = jnp.zeros((B, H), jnp.float32)
    h1 = jnp.zeros((B, H), jnp.float32)
    h2 = jnp.zeros((B, H), jnp.float32)
    for t in range(T):
        x_t = x[:, t, :]
        h0 = jax.nn.relu(jnp.dot(x_t, params["wih0"].T, precision=hp)
                         + params["bih0"]
                         + jnp.dot(h0, params["whh0"].T, precision=hp)
                         + params["bhh0"])
        h1 = jax.nn.relu(jnp.dot(h0, params["wih1"].T, precision=hp)
                         + params["bih1"]
                         + jnp.dot(h1, params["whh1"].T, precision=hp)
                         + params["bhh1"])
        h2 = jax.nn.relu(jnp.dot(h1, params["wih2"].T, precision=hp)
                         + params["bih2"]
                         + jnp.dot(h2, params["whh2"].T, precision=hp)
                         + params["bhh2"])
    return jnp.dot(h2, params["wfc"].T, precision=hp) + params["bfc"]


def reference_forward_mxu_numerics(x, params):
    """Same recurrence but with the kernel's numerics: bf16 operands for the
    hidden-state matmuls, f32 accumulation, f32 input projection / elementwise.
    Lets us check the Pallas implementation tightly, independent of the
    (intentional) bf16 rounding."""
    B, T, _ = x.shape
    H = params["whh0"].shape[0]
    hp = jax.lax.Precision.HIGHEST
    bf = jnp.bfloat16

    def bdot(a, w):  # bf16-operand, f32-accumulate dot (MXU numerics)
        return jnp.dot(a.astype(bf), w.T.astype(bf),
                       preferred_element_type=jnp.float32)

    h0 = jnp.zeros((B, H), jnp.float32)
    h1 = jnp.zeros((B, H), jnp.float32)
    h2 = jnp.zeros((B, H), jnp.float32)
    for t in range(T):
        x_t = x[:, t, :]
        h0 = jax.nn.relu(jnp.dot(x_t, params["wih0"].T, precision=hp)
                         + params["bih0"] + params["bhh0"]
                         + bdot(h0, params["whh0"]))
        h1 = jax.nn.relu(bdot(h0, params["wih1"]) + bdot(h1, params["whh1"])
                         + params["bih1"] + params["bhh1"])
        h2 = jax.nn.relu(bdot(h1, params["wih2"]) + bdot(h2, params["whh2"])
                         + params["bih2"] + params["bhh2"])
    return jnp.dot(h2, params["wfc"].T, precision=hp) + params["bfc"]


# ----------------------------------- main -------------------------------------

if __name__ == "__main__":
    B, T, F, H = 2, 8, 3, 32

    key = jax.random.PRNGKey(0)
    k_x, k_p = jax.random.split(key)
    x = jax.random.normal(k_x, (B, T, F), jnp.float32)
    params = init_params(k_p, H, F)

    packed = pack_params(params)          # one-time packing (not per call)

    y = rnn_model_forward(x, packed)
    y = jax.block_until_ready(y)
    assert y.shape == (B, 1)

    # Tight check against a reference that mirrors the kernel's MXU numerics
    # (bf16 dot operands, f32 accumulate) -> catches implementation bugs.
    y_mxu = reference_forward_mxu_numerics(x, params)
    assert jnp.allclose(y, y_mxu, atol=2e-3, rtol=2e-3), (y, y_mxu)

    # Looser check against the full-f32 PyTorch-semantics reference; the
    # tolerance accounts for the intentional bf16 MXU operands in the kernel.
    y_ref = reference_forward(x, params)
    assert jnp.allclose(y, y_ref, atol=3e-2, rtol=3e-2), (y, y_ref)

    print("KERNEL_OK")
</pallas_src>

<mosaic_0001>
module attributes {stable_mosaic.version = 11 : i64} {
  func.func @rnn_wavefront_kernel(%arg0: memref<8x2x96xf32, #tpu.memory_space<vmem>>, %arg1: memref<96x96xbf16, #tpu.memory_space<vmem>>, %arg2: memref<1x96xf32, #tpu.memory_space<vmem>>, %arg3: memref<1x96xf32, #tpu.memory_space<vmem>>, %arg4: memref<1x96xf32, #tpu.memory_space<vmem>>, %arg5: memref<1x1xf32, #tpu.memory_space<vmem>>, %arg6: memref<2x1xf32, #tpu.memory_space<vmem>>) attributes {dimension_semantics = [], scalar_prefetch = 0 : i64, scratch_operands = 0 : i64, tpu.core_type = #tpu.core_type<tc>} {
    %c0 = arith.constant 0 : index
    %c0_0 = arith.constant 0 : index
    %0 = vector.load %arg1[%c0, %c0_0] : memref<96x96xbf16, #tpu.memory_space<vmem>>, vector<96x96xbf16>
    %c0_1 = arith.constant 0 : index
    %c0_2 = arith.constant 0 : index
    %1 = vector.load %arg2[%c0_1, %c0_2] : memref<1x96xf32, #tpu.memory_space<vmem>>, vector<1x96xf32>
    %2 = vector.shape_cast %1 : vector<1x96xf32> to vector<1x96xf32>
    %3 = vector.broadcast %2 : vector<1x96xf32> to vector<2x96xf32>
    %c0_3 = arith.constant 0 : index
    %c0_4 = arith.constant 0 : index
    %4 = vector.load %arg3[%c0_3, %c0_4] : memref<1x96xf32, #tpu.memory_space<vmem>>, vector<1x96xf32>
    %5 = vector.shape_cast %4 : vector<1x96xf32> to vector<1x96xf32>
    %6 = vector.broadcast %5 : vector<1x96xf32> to vector<2x96xf32>
    %c0_5 = arith.constant 0 : index
    %c0_6 = arith.constant 0 : index
    %c0_7 = arith.constant 0 : index
    %7 = vector.load %arg0[%c0_5, %c0_6, %c0_7] : memref<8x2x96xf32, #tpu.memory_space<vmem>>, vector<1x2x96xf32>
    %8 = vector.shape_cast %7 : vector<1x2x96xf32> to vector<2x96xf32>
    %cst = arith.constant 0.000000e+00 : f32
    %9 = vector.broadcast %cst : f32 to vector<2x96xf32>
    %10 = arith.maximumf %8, %9 : vector<2x96xf32>
    %11 = arith.truncf %10 : vector<2x96xf32> to vector<2x96xbf16>
    %cst_8 = arith.constant dense<0.000000e+00> : vector<2x96xf32>
    %12 = tpu.matmul %11, %0, %cst_8 {dimension_numbers = #tpu.dot_dimension_numbers<[1], [0], [0], [1], [0, 0, 1, 1], [], []>} : vector<2x96xbf16>, vector<96x96xbf16>, vector<2x96xf32> -> vector<2x96xf32>
    %13 = arith.addf %12, %3 : vector<2x96xf32>
    %c1 = arith.constant 1 : index
    %c0_9 = arith.constant 0 : index
    %c0_10 = arith.constant 0 : index
    %14 = vector.load %arg0[%c1, %c0_9, %c0_10] : memref<8x2x96xf32, #tpu.memory_space<vmem>>, vector<1x2x96xf32>
    %15 = vector.shape_cast %14 : vector<1x2x96xf32> to vector<2x96xf32>
    %16 = arith.addf %13, %15 : vector<2x96xf32>
    %cst_11 = arith.constant 0.000000e+00 : f32
    %17 = vector.broadcast %cst_11 : f32 to vector<2x96xf32>
    %18 = arith.maximumf %16, %17 : vector<2x96xf32>
    %19 = arith.truncf %18 : vector<2x96xf32> to vector<2x96xbf16>
    %cst_12 = arith.constant dense<0.000000e+00> : vector<2x96xf32>
    %20 = tpu.matmul %19, %0, %cst_12 {dimension_numbers = #tpu.dot_dimension_numbers<[1], [0], [0], [1], [0, 0, 1, 1], [], []>} : vector<2x96xbf16>, vector<96x96xbf16>, vector<2x96xf32> -> vector<2x96xf32>
    %21 = arith.addf %20, %6 : vector<2x96xf32>
    %c2 = arith.constant 2 : index
    %c0_13 = arith.constant 0 : index
    %c0_14 = arith.constant 0 : index
    %22 = vector.load %arg0[%c2, %c0_13, %c0_14] : memref<8x2x96xf32, #tpu.memory_space<vmem>>, vector<1x2x96xf32>
    %23 = vector.shape_cast %22 : vector<1x2x96xf32> to vector<2x96xf32>
    %24 = arith.addf %21, %23 : vector<2x96xf32>
    %cst_15 = arith.constant 0.000000e+00 : f32
    %25 = vector.broadcast %cst_15 : f32 to vector<2x96xf32>
    %26 = arith.maximumf %24, %25 : vector<2x96xf32>
    %27 = arith.truncf %26 : vector<2x96xf32> to vector<2x96xbf16>
    %cst_16 = arith.constant dense<0.000000e+00> : vector<2x96xf32>
    %28 = tpu.matmul %27, %0, %cst_16 {dimension_numbers = #tpu.dot_dimension_numbers<[1], [0], [0], [1], [0, 0, 1, 1], [], []>} : vector<2x96xbf16>, vector<96x96xbf16>, vector<2x96xf32> -> vector<2x96xf32>
    %29 = arith.addf %28, %6 : vector<2x96xf32>
    %c3 = arith.constant 3 : index
    %c0_17 = arith.constant 0 : index
    %c0_18 = arith.constant 0 : index
    %30 = vector.load %arg0[%c3, %c0_17, %c0_18] : memref<8x2x96xf32, #tpu.memory_space<vmem>>, vector<1x2x96xf32>
    %31 = vector.shape_cast %30 : vector<1x2x96xf32> to vector<2x96xf32>
    %32 = arith.addf %29, %31 : vector<2x96xf32>
    %cst_19 = arith.constant 0.000000e+00 : f32
    %33 = vector.broadcast %cst_19 : f32 to vector<2x96xf32>
    %34 = arith.maximumf %32, %33 : vector<2x96xf32>
    %35 = arith.truncf %34 : vector<2x96xf32> to vector<2x96xbf16>
    %cst_20 = arith.constant dense<0.000000e+00> : vector<2x96xf32>
    %36 = tpu.matmul %35, %0, %cst_20 {dimension_numbers = #tpu.dot_dimension_numbers<[1], [0], [0], [1], [0, 0, 1, 1], [], []>} : vector<2x96xbf16>, vector<96x96xbf16>, vector<2x96xf32> -> vector<2x96xf32>
    %37 = arith.addf %36, %6 : vector<2x96xf32>
    %c4 = arith.constant 4 : index
    %c0_21 = arith.constant 0 : index
    %c0_22 = arith.constant 0 : index
    %38 = vector.load %arg0[%c4, %c0_21, %c0_22] : memref<8x2x96xf32, #tpu.memory_space<vmem>>, vector<1x2x96xf32>
    %39 = vector.shape_cast %38 : vector<1x2x96xf32> to vector<2x96xf32>
    %40 = arith.addf %37, %39 : vector<2x96xf32>
    %cst_23 = arith.constant 0.000000e+00 : f32
    %41 = vector.broadcast %cst_23 : f32 to vector<2x96xf32>
    %42 = arith.maximumf %40, %41 : vector<2x96xf32>
    %43 = arith.truncf %42 : vector<2x96xf32> to vector<2x96xbf16>
    %cst_24 = arith.constant dense<0.000000e+00> : vector<2x96xf32>
    %44 = tpu.matmul %43, %0, %cst_24 {dimension_numbers = #tpu.dot_dimension_numbers<[1], [0], [0], [1], [0, 0, 1, 1], [], []>} : vector<2x96xbf16>, vector<96x96xbf16>, vector<2x96xf32> -> vector<2x96xf32>
    %45 = arith.addf %44, %6 : vector<2x96xf32>
    %c5 = arith.constant 5 : index
    %c0_25 = arith.constant 0 : index
    %c0_26 = arith.constant 0 : index
    %46 = vector.load %arg0[%c5, %c0_25, %c0_26] : memref<8x2x96xf32, #tpu.memory_space<vmem>>, vector<1x2x96xf32>
    %47 = vector.shape_cast %46 : vector<1x2x96xf32> to vector<2x96xf32>
    %48 = arith.addf %45, %47 : vector<2x96xf32>
    %cst_27 = arith.constant 0.000000e+00 : f32
    %49 = vector.broadcast %cst_27 : f32 to vector<2x96xf32>
    %50 = arith.maximumf %48, %49 : vector<2x96xf32>
    %51 = arith.truncf %50 : vector<2x96xf32> to vector<2x96xbf16>
    %cst_28 = arith.constant dense<0.000000e+00> : vector<2x96xf32>
    %52 = tpu.matmul %51, %0, %cst_28 {dimension_numbers = #tpu.dot_dimension_numbers<[1], [0], [0], [1], [0, 0, 1, 1], [], []>} : vector<2x96xbf16>, vector<96x96xbf16>, vector<2x96xf32> -> vector<2x96xf32>
    %53 = arith.addf %52, %6 : vector<2x96xf32>
    %c6 = arith.constant 6 : index
    %c0_29 = arith.constant 0 : index
    %c0_30 = arith.constant 0 : index
    %54 = vector.load %arg0[%c6, %c0_29, %c0_30] : memref<8x2x96xf32, #tpu.memory_space<vmem>>, vector<1x2x96xf32>
    %55 = vector.shape_cast %54 : vector<1x2x96xf32> to vector<2x96xf32>
    %56 = arith.addf %53, %55 : vector<2x96xf32>
    %cst_31 = arith.constant 0.000000e+00 : f32
    %57 = vector.broadcast %cst_31 : f32 to vector<2x96xf32>
    %58 = arith.maximumf %56, %57 : vector<2x96xf32>
    %59 = arith.truncf %58 : vector<2x96xf32> to vector<2x96xbf16>
    %cst_32 = arith.constant dense<0.000000e+00> : vector<2x96xf32>
    %60 = tpu.matmul %59, %0, %cst_32 {dimension_numbers = #tpu.dot_dimension_numbers<[1], [0], [0], [1], [0, 0, 1, 1], [], []>} : vector<2x96xbf16>, vector<96x96xbf16>, vector<2x96xf32> -> vector<2x96xf32>
    %61 = arith.addf %60, %6 : vector<2x96xf32>
    %c7 = arith.constant 7 : index
    %c0_33 = arith.constant 0 : index
    %c0_34 = arith.constant 0 : index
    %62 = vector.load %arg0[%c7, %c0_33, %c0_34] : memref<8x2x96xf32, #tpu.memory_space<vmem>>, vector<1x2x96xf32>
    %63 = vector.shape_cast %62 : vector<1x2x96xf32> to vector<2x96xf32>
    %64 = arith.addf %61, %63 : vector<2x96xf32>
    %cst_35 = arith.constant 0.000000e+00 : f32
    %65 = vector.broadcast %cst_35 : f32 to vector<2x96xf32>
    %66 = arith.maximumf %64, %65 : vector<2x96xf32>
    %67 = arith.truncf %66 : vector<2x96xf32> to vector<2x96xbf16>
    %cst_36 = arith.constant dense<0.000000e+00> : vector<2x96xf32>
    %68 = tpu.matmul %67, %0, %cst_36 {dimension_numbers = #tpu.dot_dimension_numbers<[1], [0], [0], [1], [0, 0, 1, 1], [], []>} : vector<2x96xbf16>, vector<96x96xbf16>, vector<2x96xf32> -> vector<2x96xf32>
    %69 = arith.addf %68, %6 : vector<2x96xf32>
    %cst_37 = arith.constant 0.000000e+00 : f32
    %70 = vector.broadcast %cst_37 : f32 to vector<2x96xf32>
    %71 = arith.maximumf %69, %70 : vector<2x96xf32>
    %72 = arith.truncf %71 : vector<2x96xf32> to vector<2x96xbf16>
    %cst_38 = arith.constant dense<0.000000e+00> : vector<2x96xf32>
    %73 = tpu.matmul %72, %0, %cst_38 {dimension_numbers = #tpu.dot_dimension_numbers<[1], [0], [0], [1], [0, 0, 1, 1], [], []>} : vector<2x96xbf16>, vector<96x96xbf16>, vector<2x96xf32> -> vector<2x96xf32>
    %74 = arith.addf %73, %6 : vector<2x96xf32>
    %cst_39 = arith.constant 0.000000e+00 : f32
    %75 = vector.broadcast %cst_39 : f32 to vector<2x96xf32>
    %76 = arith.maximumf %74, %75 : vector<2x96xf32>
    %c0_40 = arith.constant 0 : index
    %c0_41 = arith.constant 0 : index
    %77 = vector.load %arg4[%c0_40, %c0_41] : memref<1x96xf32, #tpu.memory_space<vmem>>, vector<1x96xf32>
    %78 = vector.broadcast %77 : vector<1x96xf32> to vector<2x96xf32>
    %79 = arith.mulf %76, %78 : vector<2x96xf32>
    %cst_42 = arith.constant dense<0.000000e+00> : vector<2xf32>
    %80 = vector.multi_reduction <add>, %79, %cst_42 [1] : vector<2x96xf32> to vector<2xf32>
    %81 = vector.shape_cast %80 : vector<2xf32> to vector<2x1xf32>
    %c0_43 = arith.constant 0 : index
    %c0_44 = arith.constant 0 : index
    %82 = vector.load %arg5[%c0_43, %c0_44] : memref<1x1xf32, #tpu.memory_space<vmem>>, vector<1x1xf32>
    %83 = vector.broadcast %82 : vector<1x1xf32> to vector<2x1xf32>
    %84 = arith.addf %81, %83 : vector<2x1xf32>
    %c0_45 = arith.constant 0 : index
    %c0_46 = arith.constant 0 : index
    %85 = vector.load %arg6[%c0_45, %c0_46] : memref<2x1xf32, #tpu.memory_space<vmem>>, vector<2x1xf32>
    tpu.vector_store %arg6[%c0_45, %c0_46], %84 {strides = array<i32>} : memref<2x1xf32, #tpu.memory_space<vmem>>, vector<2x1xf32>,
    return
  }
}

</mosaic_0001>

<bundles_post_ra>
// kernel: rnn_model_forward.1
= control target key start
LH: loop header
LB: loop body
LE: loop exit
PB: predicated region body
PF: predicated region fallthrough
CT: control target
= control target key end

     0   :  { %vm85_vm0 = vcmask 785408   ;;  %vm273_vm1 = vcmask 779264   ;;  %vm282_vm2 = vcmask 1024   ;;  %s439_s1 = inlined_call_operand.vmem [shape: bf16[96,96], index: 1, kind: input, shape index: {}]   ;;  %s440_s2 = inlined_call_operand.vmem [shape: f32[1,96], index: 2, kind: input, shape index: {}]   ;;  %s441_s0 = inlined_call_operand.vmem [shape: f32[8,2,96], index: 0, kind: input, shape index: {}]   ;;  %s442_s3 = inlined_call_operand.vmem [shape: f32[1,96], index: 3, kind: input, shape index: {}]   ;;  %s443_s4 = inlined_call_operand.vmem [shape: f32[1,96], index: 4, kind: input, shape index: {}]   ;;  %s444_s5 = inlined_call_operand.<no memory space> [shape: f32[1,1], index: 5, kind: input, shape index: {}]   ;;  %s445_s6 = inlined_call_operand.vmem [shape: f32[2,1], index: 6, kind: output, shape index: {}]  }
   0x1   :  { %v333_v0 = vld [vmem:[%s439_s1 + $0x28] sm:$0xff]  ;;  %v332_v1 = vld [vmem:[%s439_s1 + $0x20] sm:$0xff]  ;;  %v331_v2 = vld [vmem:[%s439_s1 + $0x18] sm:$0xff] }
   0x2   :  { %91 = vmatpush.bf16.msra.mxu0 %v333_v0  ;;  %112 = vmatpush.bf16.msra.mxu1 %v333_v0  ;;  %v330_v3 = vld [vmem:[%s439_s1 + $0x10] sm:$0xff]  ;;  %v329_v4 = vld [vmem:[%s439_s1 + $0x8] sm:$0xff]  ;;  %v46_v5 = vld [vmem:[%s441_s0] sm:$0x3] }
   0x3   :  { %133 = vmatpush.bf16.msra.mxu2 %v333_v0  ;;  %154 = vmatpush.bf16.msra.mxu3 %v333_v0  ;;  %v47_v6 = vmax.f32 %v46_v5, 0.0  ;;  %v328_v7 = vld [vmem:[%s439_s1] sm:$0xff]  ;;  %v319_v33 = vld [vmem:[%s441_s0 + $0x8] sm:$0x3]  ;;  %v321_v40 = vld [vmem:[%s441_s0 + $0xa] sm:$0x3] }
   0x4   :  { %v334_v9 = vld [vmem:[%s440_s2] ss:$0 sm:$0xff]  ;;  %v313_v11 = vld [vmem:[%s441_s0 + $0x2] sm:$0x3]  ;;  %v315_v19 = vld [vmem:[%s441_s0 + $0x4] sm:$0x3] }
   0x5   :  { %v48_v8 = vpack.c.bf16 %v47_v6, %v47_v6  ;;  %v335_v17 = vld [vmem:[%s442_s3] ss:$0 sm:$0xff]  ;;  %v317_v26 = vld [vmem:[%s441_s0 + $0x6] sm:$0x3]  ;;  %v323_v47 = vld [vmem:[%s441_s0 + $0xc] sm:$0x3] }
   0x6   :  { %92 = vmatpush.bf16.msra.mxu0 %v332_v1  ;;  %113 = vmatpush.bf16.msra.mxu1 %v332_v1  ;;  %v325_v54 = vld [vmem:[%s441_s0 + $0xe] sm:$0x3] }
   0x7   :  { %134 = vmatpush.bf16.msra.mxu2 %v332_v1  ;;  %155 = vmatpush.bf16.msra.mxu3 %v332_v1 }
   0xa   :  { %93 = vmatpush.bf16.msra.mxu0 %v331_v2  ;;  %114 = vmatpush.bf16.msra.mxu1 %v331_v2 }
   0xb   :  { %135 = vmatpush.bf16.msra.mxu2 %v331_v2  ;;  %156 = vmatpush.bf16.msra.mxu3 %v331_v2 }
   0xe   :  { %94 = vmatpush.bf16.msra.mxu0 %v330_v3  ;;  %115 = vmatpush.bf16.msra.mxu1 %v330_v3 }
   0xf   :  { %136 = vmatpush.bf16.msra.mxu2 %v330_v3  ;;  %157 = vmatpush.bf16.msra.mxu3 %v330_v3 }
  0x12   :  { %95 = vmatpush.bf16.msra.mxu0 %v329_v4  ;;  %116 = vmatpush.bf16.msra.mxu1 %v329_v4 }
  0x13   :  { %137 = vmatpush.bf16.msra.mxu2 %v329_v4  ;;  %158 = vmatpush.bf16.msra.mxu3 %v329_v4 }
  0x16   :  { %96 = vmatpush.bf16.msra.mxu0 %v328_v7  ;;  %117 = vmatpush.bf16.msra.mxu1 %v328_v7 }
  0x17   :  { %138 = vmatpush.bf16.msra.mxu2 %v328_v7  ;;  %159 = vmatpush.bf16.msra.mxu3 %v328_v7 }
  0x19   :  { %312 = vmatmul.msk.bf16.vlgmr.msra.gmra.mxu0 %vm85_vm0, %v48_v8 }
  0x1a   :  { %175 = vmatpush.bf16.msrb.mxu0 %v333_v0  ;;  %196 = vmatpush.bf16.msrb.mxu1 %v333_v0 }
  0x1b   :  { %217 = vmatpush.bf16.msrb.mxu2 %v333_v0  ;;  %238 = vmatpush.bf16.msrb.mxu3 %v333_v0 }
  0x1e   :  { %176 = vmatpush.bf16.msrb.mxu0 %v332_v1  ;;  %197 = vmatpush.bf16.msrb.mxu1 %v332_v1 }
  0x1f   :  { %218 = vmatpush.bf16.msrb.mxu2 %v332_v1  ;;  %239 = vmatpush.bf16.msrb.mxu3 %v332_v1 }
  0x22   :  { %177 = vmatpush.bf16.msrb.mxu0 %v331_v2  ;;  %198 = vmatpush.bf16.msrb.mxu1 %v331_v2 }
  0x23   :  { %219 = vmatpush.bf16.msrb.mxu2 %v331_v2  ;;  %240 = vmatpush.bf16.msrb.mxu3 %v331_v2 }
  0x26   :  { %178 = vmatpush.bf16.msrb.mxu0 %v330_v3  ;;  %199 = vmatpush.bf16.msrb.mxu1 %v330_v3 }
  0x27   :  { %220 = vmatpush.bf16.msrb.mxu2 %v330_v3  ;;  %241 = vmatpush.bf16.msrb.mxu3 %v330_v3 }
  0x2a   :  { %179 = vmatpush.bf16.msrb.mxu0 %v329_v4  ;;  %200 = vmatpush.bf16.msrb.mxu1 %v329_v4 }
  0x2b   :  { %221 = vmatpush.bf16.msrb.mxu2 %v329_v4  ;;  %242 = vmatpush.bf16.msrb.mxu3 %v329_v4 }
  0x2e   :  { %180 = vmatpush.bf16.msrb.mxu0 %v328_v7  ;;  %201 = vmatpush.bf16.msrb.mxu1 %v328_v7 }
  0x2f   :  { %222 = vmatpush.bf16.msrb.mxu2 %v328_v7  ;;  %243 = vmatpush.bf16.msrb.mxu3 %v328_v7 }
  0x32   :  { %256 = vmatpush.bf16.msra.mxu0 %v333_v0 }
  0x36   :  { %257 = vmatpush.bf16.msra.mxu0 %v332_v1  ;;  %v11_v1 = vstv %s444_s5 }
  0x37   :  { %12 = vst [vmem:[#allocation2] sm:$0x1] %v11_v1 }
  0x3a   :  { %258 = vmatpush.bf16.msra.mxu0 %v331_v2 }
  0x3e   :  { %259 = vmatpush.bf16.msra.mxu0 %v330_v3 }
  0x42   :  { %260 = vmatpush.bf16.msra.mxu0 %v329_v4  ;;  %v336_v4 = vld [vmem:[%s443_s4] ss:$0 sm:$0xff] }
  0x46   :  { %261 = vmatpush.bf16.msra.mxu0 %v328_v7 }
  0x96   :  { %v98_v10 = vpop.f32.mrf.mxu0 }
  0x97   :  { %v99_v12 = vadd.f32 %v334_v9, %v98_v10  ;;  %v337_v9 = vld [vmem:[#allocation2] ss:$0 sm:$0xff] }
  0x99   :  { %v104_v13 = vadd.f32 %v313_v11, %v99_v12 }
  0x9b   :  { %v105_v14 = vmax.f32 %v104_v13, 0.0 }
  0x9d   :  { %v106_v15 = vpack.c.bf16 %v105_v14, %v105_v14 }
  0x9e   :  { %v100_v16 = vpop.f32.mrf.mxu0 }
  0x9f   :  { %314 = vmatmul.msk.bf16.vlgmr.msra.gmra.mxu1 %vm85_vm0, %v106_v15 }
 0x11c   :  { %v119_v18 = vpop.f32.mrf.mxu1 }
 0x11d   :  { %v120_v20 = vadd.f32 %v335_v17, %v119_v18 }
 0x11f   :  { %v125_v21 = vadd.f32 %v315_v19, %v120_v20 }
 0x121   :  { %v126_v22 = vmax.f32 %v125_v21, 0.0 }
 0x123   :  { %v127_v23 = vpack.c.bf16 %v126_v22, %v126_v22 }
 0x124   :  { %v121_v24 = vpop.f32.mrf.mxu1 }
 0x125   :  { %316 = vmatmul.msk.bf16.vlgmr.msra.gmra.mxu2 %vm85_vm0, %v127_v23 }
 0x1a8   :  { %v140_v25 = vpop.f32.mrf.mxu2 }
 0x1a9   :  { %v141_v27 = vadd.f32 %v335_v17, %v140_v25 }
 0x1ab   :  { %v146_v28 = vadd.f32 %v317_v26, %v141_v27 }
 0x1ad   :  { %v147_v29 = vmax.f32 %v146_v28, 0.0 }
 0x1af   :  { %v148_v30 = vpack.c.bf16 %v147_v29, %v147_v29 }
 0x1b0   :  { %v142_v31 = vpop.f32.mrf.mxu2 }
 0x1b1   :  { %318 = vmatmul.msk.bf16.vlgmr.msra.gmra.mxu3 %vm85_vm0, %v148_v30 }
 0x234   :  { %v161_v32 = vpop.f32.mrf.mxu3 }
 0x235   :  { %v162_v34 = vadd.f32 %v335_v17, %v161_v32 }
 0x237   :  { %v167_v35 = vadd.f32 %v319_v33, %v162_v34 }
 0x239   :  { %v168_v36 = vmax.f32 %v167_v35, 0.0 }
 0x23b   :  { %v169_v37 = vpack.c.bf16 %v168_v36, %v168_v36 }
 0x23c   :  { %v163_v38 = vpop.f32.mrf.mxu3 }
 0x23d   :  { %320 = vmatmul.msk.bf16.vlgmr.msrb.gmra.mxu0 %vm85_vm0, %v169_v37 }
 0x2ba   :  { %v182_v39 = vpop.f32.mrf.mxu0 }
 0x2bb   :  { %v183_v41 = vadd.f32 %v335_v17, %v182_v39 }
 0x2bd   :  { %v188_v42 = vadd.f32 %v321_v40, %v183_v41 }
 0x2bf   :  { %v189_v43 = vmax.f32 %v188_v42, 0.0 }
 0x2c1   :  { %v190_v44 = vpack.c.bf16 %v189_v43, %v189_v43 }
 0x2c2   :  { %v184_v45 = vpop.f32.mrf.mxu0 }
 0x2c3   :  { %322 = vmatmul.msk.bf16.vlgmr.msrb.gmra.mxu1 %vm85_vm0, %v190_v44 }
 0x340   :  { %v203_v46 = vpop.f32.mrf.mxu1 }
 0x341   :  { %v204_v48 = vadd.f32 %v335_v17, %v203_v46 }
 0x343   :  { %v209_v49 = vadd.f32 %v323_v47, %v204_v48 }
 0x345   :  { %v210_v50 = vmax.f32 %v209_v49, 0.0 }
 0x347   :  { %v211_v51 = vpack.c.bf16 %v210_v50, %v210_v50 }
 0x348   :  { %v205_v52 = vpop.f32.mrf.mxu1 }
 0x349   :  { %324 = vmatmul.msk.bf16.vlgmr.msrb.gmra.mxu2 %vm85_vm0, %v211_v51 }
 0x3cc   :  { %v224_v53 = vpop.f32.mrf.mxu2 }
 0x3cd   :  { %v225_v55 = vadd.f32 %v335_v17, %v224_v53 }
 0x3cf   :  { %v230_v56 = vadd.f32 %v325_v54, %v225_v55 }
 0x3d1   :  { %v231_v57 = vmax.f32 %v230_v56, 0.0 }
 0x3d3   :  { %v232_v58 = vpack.c.bf16 %v231_v57, %v231_v57 }
 0x3d4   :  { %v226_v59 = vpop.f32.mrf.mxu2 }
 0x3d5   :  { %326 = vmatmul.msk.bf16.vlgmr.msrb.gmra.mxu3 %vm85_vm0, %v232_v58 }
 0x458   :  { %v245_v60 = vpop.f32.mrf.mxu3 }
 0x459   :  { %v246_v61 = vadd.f32 %v335_v17, %v245_v60 }
 0x45b   :  { %v249_v62 = vmax.f32 %v246_v61, 0.0 }
 0x45d   :  { %v250_v63 = vpack.c.bf16 %v249_v62, %v249_v62 }
 0x45f   :  { %327 = vmatmul.msk.bf16.vlgmr.msra.gmra.mxu0 %vm85_vm0, %v250_v63 }
 0x460   :  { %v247_v0 = vpop.f32.mrf.mxu3 }
 0x4dc   :  { %v263_v2 = vpop.f32.mrf.mxu0 }
 0x4dd   :  { %v264_v3 = vadd.f32 %v335_v17, %v263_v2 }
 0x4df   :  { %v267_v5 = vmax.f32 %v264_v3, 0.0 }
 0x4e1   :  { %v272_v6 = vmul.f32 %v336_v4, %v267_v5 }
 0x4e3   :  { %v274_v7 = vsel %vm273_vm1, %v272_v6, 0.0 }
 0x4e4   :  { %v265_v8 = vpop.f32.mrf.mxu0  ;;  %275 = vadd.xlane.f32.xlu0 %v274_v7 }
 0x557   :  { %v276_v10 = vpop.xlane.xlu0 %275 }
 0x558   :  { %v281_v11 = vadd.f32 %v337_v9, %v276_v10 }
 0x55a   :  { %283 = vst.msk [vmem:[%s445_s6] sm:$0x3] %vm282_vm2, %v281_v11 }

</bundles_post_ra>
